<compile_context>
chip_gen: v6e
topology: v6e:2x2x1
jax: 0.10.0
libtpu: 0.0.40
codegen_flags: <defaults>
</compile_context>

<pallas_src>
import jax
import jax.numpy as jnp
from jax.experimental import pallas as pl
from jax.experimental.pallas import tpu as pltpu

DROPOUT = 0.1          # identity at inference time
N_EMBD = 64
NUM_HEADS = 4
HEAD_SIZE = N_EMBD // NUM_HEADS   # 16


def _round_up(x, m):
    return ((x + m - 1) // m) * m


def mhca_kernel(q_ref, enc_ref, wq_ref, wk_ref, wv_ref, wp_ref, bp_ref, o_ref):
    # q_ref:   (1, TQ, N_EMBD)  f32   decoder queries (row tile)
    # enc_ref: (1, TE, N_EMBD)  f32   encoder output (full length, VMEM-resident per batch)
    # wq/wk/wv_ref: (H, N_EMBD, HEAD_SIZE) bf16
    # wp_ref:  (H, HEAD_SIZE, N_EMBD) bf16
    # bp_ref:  (1, N_EMBD) f32
    # o_ref:   (1, TQ, N_EMBD) f32
    xq = q_ref[0].astype(jnp.bfloat16)     # (TQ, D)  bf16 MXU operand
    xe = enc_ref[0].astype(jnp.bfloat16)   # (TE, D)
    tq = xq.shape[0]
    scale = HEAD_SIZE ** -0.5

    acc = jnp.zeros((tq, N_EMBD), jnp.float32)
    for h in range(NUM_HEADS):             # static 4-iteration loop
        qh = jnp.dot(xq, wq_ref[h], preferred_element_type=jnp.float32)   # (TQ, HS)
        kh = jnp.dot(xe, wk_ref[h], preferred_element_type=jnp.float32)   # (TE, HS)
        vh = jnp.dot(xe, wv_ref[h], preferred_element_type=jnp.float32)   # (TE, HS)

        # scores = q @ k^T * head_size^-0.5   (contract the head dim, no explicit transpose)
        s = jax.lax.dot_general(
            qh.astype(jnp.bfloat16), kh.astype(jnp.bfloat16),
            (((1,), (1,)), ((), ())),
            preferred_element_type=jnp.float32) * scale                    # (TQ, TE)

        # numerically-stable softmax in f32 (exp -> EUP, reductions -> XLU)
        s_max = jnp.max(s, axis=-1, keepdims=True)
        p = jnp.exp(s - s_max)
        denom = jnp.sum(p, axis=-1, keepdims=True)
        attn = p * pl.reciprocal(denom, approx=True)
        # TODO(synk): attention-weight dropout skipped (eval-mode identity).

        oh = jnp.dot(attn.astype(jnp.bfloat16), vh.astype(jnp.bfloat16),
                     preferred_element_type=jnp.float32)                   # (TQ, HS)
        # concat-then-proj == sum over heads of o_h @ Wp[h]
        acc = acc + jnp.dot(oh.astype(jnp.bfloat16), wp_ref[h],
                            preferred_element_type=jnp.float32)            # (TQ, D)

    y = acc + bp_ref[...]                   # (1, D) broadcasts over rows
    # TODO(synk): output dropout skipped (eval-mode identity).
    o_ref[0] = y.astype(o_ref.dtype)


def mhca_forward(query_input, encoder_output, wq, wk, wv, wp, bp, *, q_tile=256):
    """query_input: (B, T_dec, N_EMBD); encoder_output: (B, T_enc, N_EMBD) -> (B, T_dec, N_EMBD)."""
    B, T_dec, D = query_input.shape
    Be, T_enc, De = encoder_output.shape
    assert D == N_EMBD and De == N_EMBD and Be == B

    # Row tile over the decoder (query) axis: multiple of 8 sublanes, capped at q_tile.
    TQ = _round_up(min(q_tile, _round_up(T_dec, 8)), 8)
    T_pad = _round_up(T_dec, TQ)
    if T_pad != T_dec:
        query_input = jnp.pad(query_input, ((0, 0), (0, T_pad - T_dec), (0, 0)))

    grid = (B, pl.cdiv(T_pad, TQ))

    # Weights go to HBM as bf16 (half the weight bytes; fed straight to the MXU).
    wq_b = wq.astype(jnp.bfloat16)
    wk_b = wk.astype(jnp.bfloat16)
    wv_b = wv.astype(jnp.bfloat16)
    wp_b = wp.astype(jnp.bfloat16)
    bp2 = bp.reshape(1, N_EMBD).astype(jnp.float32)

    out = pl.pallas_call(
        mhca_kernel,
        out_shape=jax.ShapeDtypeStruct((B, T_pad, N_EMBD), query_input.dtype),
        grid_spec=pltpu.PrefetchScalarGridSpec(
            num_scalar_prefetch=0,
            grid=grid,
            in_specs=[
                # query row tile: pipelined / double-buffered across the grid
                pl.BlockSpec((1, TQ, N_EMBD), lambda b, t: (b, t, 0)),
                # full encoder sequence for this batch element (softmax reduction axis)
                pl.BlockSpec((1, T_enc, N_EMBD), lambda b, t: (b, 0, 0)),
                # weights/bias: constant index_map -> stay VMEM-resident across the grid
                pl.BlockSpec((NUM_HEADS, N_EMBD, HEAD_SIZE), lambda b, t: (0, 0, 0)),
                pl.BlockSpec((NUM_HEADS, N_EMBD, HEAD_SIZE), lambda b, t: (0, 0, 0)),
                pl.BlockSpec((NUM_HEADS, N_EMBD, HEAD_SIZE), lambda b, t: (0, 0, 0)),
                pl.BlockSpec((NUM_HEADS, HEAD_SIZE, N_EMBD), lambda b, t: (0, 0, 0)),
                pl.BlockSpec((1, N_EMBD), lambda b, t: (0, 0)),
            ],
            out_specs=pl.BlockSpec((1, TQ, N_EMBD), lambda b, t: (b, t, 0)),
        ),
        compiler_params=pltpu.CompilerParams(
            dimension_semantics=("parallel", "parallel"),
            vmem_limit_bytes=32 * 1024 * 1024,
        ),
    )(query_input, encoder_output, wq_b, wk_b, wv_b, wp_b, bp2)
    return out[:, :T_dec, :]


def ref_forward(query_input, encoder_output, wq, wk, wv, wp, bp):
    """Pure-JAX f32 reference with identical math (eval-mode dropout = identity)."""
    scale = HEAD_SIZE ** -0.5
    q = jnp.einsum('btd,hde->bhte', query_input, wq)
    k = jnp.einsum('bsd,hde->bhse', encoder_output, wk)
    v = jnp.einsum('bsd,hde->bhse', encoder_output, wv)
    s = jnp.einsum('bhte,bhse->bhts', q, k) * scale
    attn = jax.nn.softmax(s, axis=-1)
    o = jnp.einsum('bhts,bhse->bhte', attn, v)
    return jnp.einsum('bhte,heD->btD', o, wp) + bp


def init_params(key):
    # Mimic nn.Linear's uniform(-1/sqrt(fan_in), 1/sqrt(fan_in)); fan_in = 64 everywhere.
    ks = jax.random.split(key, 5)
    bound = 1.0 / (N_EMBD ** 0.5)
    wq = jax.random.uniform(ks[0], (NUM_HEADS, N_EMBD, HEAD_SIZE), jnp.float32, -bound, bound)
    wk = jax.random.uniform(ks[1], (NUM_HEADS, N_EMBD, HEAD_SIZE), jnp.float32, -bound, bound)
    wv = jax.random.uniform(ks[2], (NUM_HEADS, N_EMBD, HEAD_SIZE), jnp.float32, -bound, bound)
    wp = jax.random.uniform(ks[3], (NUM_HEADS, HEAD_SIZE, N_EMBD), jnp.float32, -bound, bound)
    bp = jax.random.uniform(ks[4], (N_EMBD,), jnp.float32, -bound, bound)
    return wq, wk, wv, wp, bp


if __name__ == "__main__":
    key = jax.random.PRNGKey(0)
    kq, ke, kp = jax.random.split(key, 3)
    batch, t_dec, t_enc = 2, 8, 16
    query_input = jax.random.normal(kq, (batch, t_dec, N_EMBD), jnp.float32)
    encoder_output = jax.random.normal(ke, (batch, t_enc, N_EMBD), jnp.float32)
    params = init_params(kp)

    y = mhca_forward(query_input, encoder_output, *params)
    jax.block_until_ready(y)

    y_ref = ref_forward(query_input, encoder_output, *params)
    max_err = float(jnp.max(jnp.abs(y - y_ref)))
    assert jnp.allclose(y, y_ref, atol=5e-2, rtol=5e-2), \
        f"mismatch vs reference (max abs err {max_err})"

    print("KERNEL_OK")
</pallas_src>

<mosaic_0001>
module attributes {stable_mosaic.version = 11 : i64} {
  func.func @mhca_kernel(%arg0: i32, %arg1: i32, %arg2: memref<1x8x64xf32, #tpu.memory_space<vmem>>, %arg3: memref<1x16x64xf32, #tpu.memory_space<vmem>>, %arg4: memref<4x64x16xbf16, #tpu.memory_space<vmem>>, %arg5: memref<4x64x16xbf16, #tpu.memory_space<vmem>>, %arg6: memref<4x64x16xbf16, #tpu.memory_space<vmem>>, %arg7: memref<4x16x64xbf16, #tpu.memory_space<vmem>>, %arg8: memref<1x64xf32, #tpu.memory_space<vmem>>, %arg9: memref<1x8x64xf32, #tpu.memory_space<vmem>>) attributes {dimension_semantics = [#tpu.dimension_semantics<parallel>, #tpu.dimension_semantics<parallel>], iteration_bounds = array<i64: 2, 1>, scalar_prefetch = 0 : i64, scratch_operands = 0 : i64, tpu.core_type = #tpu.core_type<tc>, window_params = [{transform_indices = @transform_0, window_bounds = array<i64: 1, 8, 64>}, {transform_indices = @transform_1, window_bounds = array<i64: 1, 16, 64>}, {pipeline_mode = #tpu.pipeline_mode<synchronous>, transform_indices = @transform_2, window_bounds = array<i64: 4, 64, 16>}, {pipeline_mode = #tpu.pipeline_mode<synchronous>, transform_indices = @transform_3, window_bounds = array<i64: 4, 64, 16>}, {pipeline_mode = #tpu.pipeline_mode<synchronous>, transform_indices = @transform_4, window_bounds = array<i64: 4, 64, 16>}, {pipeline_mode = #tpu.pipeline_mode<synchronous>, transform_indices = @transform_5, window_bounds = array<i64: 4, 16, 64>}, {pipeline_mode = #tpu.pipeline_mode<synchronous>, transform_indices = @transform_6, window_bounds = array<i64: 1, 64>}, {transform_indices = @transform_7, window_bounds = array<i64: 1, 8, 64>}]} {
    %c0 = arith.constant 0 : index
    %c0_0 = arith.constant 0 : index
    %c0_1 = arith.constant 0 : index
    %0 = vector.load %arg2[%c0, %c0_0, %c0_1] : memref<1x8x64xf32, #tpu.memory_space<vmem>>, vector<1x8x64xf32>
    %1 = vector.shape_cast %0 : vector<1x8x64xf32> to vector<8x64xf32>
    %2 = arith.truncf %1 : vector<8x64xf32> to vector<8x64xbf16>
    %c0_2 = arith.constant 0 : index
    %c0_3 = arith.constant 0 : index
    %c0_4 = arith.constant 0 : index
    %3 = vector.load %arg3[%c0_2, %c0_3, %c0_4] : memref<1x16x64xf32, #tpu.memory_space<vmem>>, vector<1x16x64xf32>
    %4 = vector.shape_cast %3 : vector<1x16x64xf32> to vector<16x64xf32>
    %5 = arith.truncf %4 : vector<16x64xf32> to vector<16x64xbf16>
    %cst = arith.constant 0.000000e+00 : f32
    %6 = vector.broadcast %cst : f32 to vector<8x64xf32>
    %c0_5 = arith.constant 0 : index
    %c0_6 = arith.constant 0 : index
    %c0_7 = arith.constant 0 : index
    %7 = vector.load %arg4[%c0_5, %c0_6, %c0_7] : memref<4x64x16xbf16, #tpu.memory_space<vmem>>, vector<1x64x16xbf16>
    %8 = vector.shape_cast %7 : vector<1x64x16xbf16> to vector<64x16xbf16>
    %cst_8 = arith.constant dense<0.000000e+00> : vector<8x16xf32>
    %9 = tpu.matmul %2, %8, %cst_8 {dimension_numbers = #tpu.dot_dimension_numbers<[1], [0], [0], [1], [0, 0, 1, 1], [], []>} : vector<8x64xbf16>, vector<64x16xbf16>, vector<8x16xf32> -> vector<8x16xf32>
    %c0_9 = arith.constant 0 : index
    %c0_10 = arith.constant 0 : index
    %c0_11 = arith.constant 0 : index
    %10 = vector.load %arg5[%c0_9, %c0_10, %c0_11] : memref<4x64x16xbf16, #tpu.memory_space<vmem>>, vector<1x64x16xbf16>
    %11 = vector.shape_cast %10 : vector<1x64x16xbf16> to vector<64x16xbf16>
    %cst_12 = arith.constant dense<0.000000e+00> : vector<16x16xf32>
    %12 = tpu.matmul %5, %11, %cst_12 {dimension_numbers = #tpu.dot_dimension_numbers<[1], [0], [0], [1], [0, 0, 1, 1], [], []>} : vector<16x64xbf16>, vector<64x16xbf16>, vector<16x16xf32> -> vector<16x16xf32>
    %c0_13 = arith.constant 0 : index
    %c0_14 = arith.constant 0 : index
    %c0_15 = arith.constant 0 : index
    %13 = vector.load %arg6[%c0_13, %c0_14, %c0_15] : memref<4x64x16xbf16, #tpu.memory_space<vmem>>, vector<1x64x16xbf16>
    %14 = vector.shape_cast %13 : vector<1x64x16xbf16> to vector<64x16xbf16>
    %cst_16 = arith.constant dense<0.000000e+00> : vector<16x16xf32>
    %15 = tpu.matmul %5, %14, %cst_16 {dimension_numbers = #tpu.dot_dimension_numbers<[1], [0], [0], [1], [0, 0, 1, 1], [], []>} : vector<16x64xbf16>, vector<64x16xbf16>, vector<16x16xf32> -> vector<16x16xf32>
    %16 = arith.truncf %9 : vector<8x16xf32> to vector<8x16xbf16>
    %17 = arith.truncf %12 : vector<16x16xf32> to vector<16x16xbf16>
    %cst_17 = arith.constant dense<0.000000e+00> : vector<8x16xf32>
    %18 = tpu.matmul %16, %17, %cst_17 {dimension_numbers = #tpu.dot_dimension_numbers<[1], [1], [0], [0], [0, 0, 1, 0], [], []>} : vector<8x16xbf16>, vector<16x16xbf16>, vector<8x16xf32> -> vector<8x16xf32>
    %cst_18 = arith.constant 2.500000e-01 : f32
    %19 = vector.broadcast %cst_18 : f32 to vector<8x16xf32>
    %20 = arith.mulf %18, %19 : vector<8x16xf32>
    %cst_19 = arith.constant dense<0xFF800000> : vector<8xf32>
    %21 = vector.multi_reduction <maximumf>, %20, %cst_19 [1] : vector<8x16xf32> to vector<8xf32>
    %22 = vector.shape_cast %21 : vector<8xf32> to vector<8x1xf32>
    %23 = vector.broadcast %22 : vector<8x1xf32> to vector<8x16xf32>
    %24 = arith.subf %20, %23 : vector<8x16xf32>
    %25 = math.exp %24 : vector<8x16xf32>
    %cst_20 = arith.constant dense<0.000000e+00> : vector<8xf32>
    %26 = vector.multi_reduction <add>, %25, %cst_20 [1] : vector<8x16xf32> to vector<8xf32>
    %27 = vector.shape_cast %26 : vector<8xf32> to vector<8x1xf32>
    %28 = tpu.reciprocal %27 {approx = true} : vector<8x1xf32> -> vector<8x1xf32>
    %29 = vector.broadcast %28 : vector<8x1xf32> to vector<8x16xf32>
    %30 = arith.mulf %25, %29 : vector<8x16xf32>
    %31 = arith.truncf %30 : vector<8x16xf32> to vector<8x16xbf16>
    %32 = arith.truncf %15 : vector<16x16xf32> to vector<16x16xbf16>
    %cst_21 = arith.constant dense<0.000000e+00> : vector<8x16xf32>
    %33 = tpu.matmul %31, %32, %cst_21 {dimension_numbers = #tpu.dot_dimension_numbers<[1], [0], [0], [1], [0, 0, 1, 1], [], []>} : vector<8x16xbf16>, vector<16x16xbf16>, vector<8x16xf32> -> vector<8x16xf32>
    %34 = arith.truncf %33 : vector<8x16xf32> to vector<8x16xbf16>
    %c0_22 = arith.constant 0 : index
    %c0_23 = arith.constant 0 : index
    %c0_24 = arith.constant 0 : index
    %35 = vector.load %arg7[%c0_22, %c0_23, %c0_24] : memref<4x16x64xbf16, #tpu.memory_space<vmem>>, vector<1x16x64xbf16>
    %36 = vector.shape_cast %35 : vector<1x16x64xbf16> to vector<16x64xbf16>
    %cst_25 = arith.constant dense<0.000000e+00> : vector<8x64xf32>
    %37 = tpu.matmul %34, %36, %cst_25 {dimension_numbers = #tpu.dot_dimension_numbers<[1], [0], [0], [1], [0, 0, 1, 1], [], []>} : vector<8x16xbf16>, vector<16x64xbf16>, vector<8x64xf32> -> vector<8x64xf32>
    %38 = arith.addf %6, %37 : vector<8x64xf32>
    %c1 = arith.constant 1 : index
    %c0_26 = arith.constant 0 : index
    %c0_27 = arith.constant 0 : index
    %39 = vector.load %arg4[%c1, %c0_26, %c0_27] : memref<4x64x16xbf16, #tpu.memory_space<vmem>>, vector<1x64x16xbf16>
    %40 = vector.shape_cast %39 : vector<1x64x16xbf16> to vector<64x16xbf16>
    %cst_28 = arith.constant dense<0.000000e+00> : vector<8x16xf32>
    %41 = tpu.matmul %2, %40, %cst_28 {dimension_numbers = #tpu.dot_dimension_numbers<[1], [0], [0], [1], [0, 0, 1, 1], [], []>} : vector<8x64xbf16>, vector<64x16xbf16>, vector<8x16xf32> -> vector<8x16xf32>
    %c1_29 = arith.constant 1 : index
    %c0_30 = arith.constant 0 : index
    %c0_31 = arith.constant 0 : index
    %42 = vector.load %arg5[%c1_29, %c0_30, %c0_31] : memref<4x64x16xbf16, #tpu.memory_space<vmem>>, vector<1x64x16xbf16>
    %43 = vector.shape_cast %42 : vector<1x64x16xbf16> to vector<64x16xbf16>
    %cst_32 = arith.constant dense<0.000000e+00> : vector<16x16xf32>
    %44 = tpu.matmul %5, %43, %cst_32 {dimension_numbers = #tpu.dot_dimension_numbers<[1], [0], [0], [1], [0, 0, 1, 1], [], []>} : vector<16x64xbf16>, vector<64x16xbf16>, vector<16x16xf32> -> vector<16x16xf32>
    %c1_33 = arith.constant 1 : index
    %c0_34 = arith.constant 0 : index
    %c0_35 = arith.constant 0 : index
    %45 = vector.load %arg6[%c1_33, %c0_34, %c0_35] : memref<4x64x16xbf16, #tpu.memory_space<vmem>>, vector<1x64x16xbf16>
    %46 = vector.shape_cast %45 : vector<1x64x16xbf16> to vector<64x16xbf16>
    %cst_36 = arith.constant dense<0.000000e+00> : vector<16x16xf32>
    %47 = tpu.matmul %5, %46, %cst_36 {dimension_numbers = #tpu.dot_dimension_numbers<[1], [0], [0], [1], [0, 0, 1, 1], [], []>} : vector<16x64xbf16>, vector<64x16xbf16>, vector<16x16xf32> -> vector<16x16xf32>
    %48 = arith.truncf %41 : vector<8x16xf32> to vector<8x16xbf16>
    %49 = arith.truncf %44 : vector<16x16xf32> to vector<16x16xbf16>
    %cst_37 = arith.constant dense<0.000000e+00> : vector<8x16xf32>
    %50 = tpu.matmul %48, %49, %cst_37 {dimension_numbers = #tpu.dot_dimension_numbers<[1], [1], [0], [0], [0, 0, 1, 0], [], []>} : vector<8x16xbf16>, vector<16x16xbf16>, vector<8x16xf32> -> vector<8x16xf32>
    %cst_38 = arith.constant 2.500000e-01 : f32
    %51 = vector.broadcast %cst_38 : f32 to vector<8x16xf32>
    %52 = arith.mulf %50, %51 : vector<8x16xf32>
    %cst_39 = arith.constant dense<0xFF800000> : vector<8xf32>
    %53 = vector.multi_reduction <maximumf>, %52, %cst_39 [1] : vector<8x16xf32> to vector<8xf32>
    %54 = vector.shape_cast %53 : vector<8xf32> to vector<8x1xf32>
    %55 = vector.broadcast %54 : vector<8x1xf32> to vector<8x16xf32>
    %56 = arith.subf %52, %55 : vector<8x16xf32>
    %57 = math.exp %56 : vector<8x16xf32>
    %cst_40 = arith.constant dense<0.000000e+00> : vector<8xf32>
    %58 = vector.multi_reduction <add>, %57, %cst_40 [1] : vector<8x16xf32> to vector<8xf32>
    %59 = vector.shape_cast %58 : vector<8xf32> to vector<8x1xf32>
    %60 = tpu.reciprocal %59 {approx = true} : vector<8x1xf32> -> vector<8x1xf32>
    %61 = vector.broadcast %60 : vector<8x1xf32> to vector<8x16xf32>
    %62 = arith.mulf %57, %61 : vector<8x16xf32>
    %63 = arith.truncf %62 : vector<8x16xf32> to vector<8x16xbf16>
    %64 = arith.truncf %47 : vector<16x16xf32> to vector<16x16xbf16>
    %cst_41 = arith.constant dense<0.000000e+00> : vector<8x16xf32>
    %65 = tpu.matmul %63, %64, %cst_41 {dimension_numbers = #tpu.dot_dimension_numbers<[1], [0], [0], [1], [0, 0, 1, 1], [], []>} : vector<8x16xbf16>, vector<16x16xbf16>, vector<8x16xf32> -> vector<8x16xf32>
    %66 = arith.truncf %65 : vector<8x16xf32> to vector<8x16xbf16>
    %c1_42 = arith.constant 1 : index
    %c0_43 = arith.constant 0 : index
    %c0_44 = arith.constant 0 : index
    %67 = vector.load %arg7[%c1_42, %c0_43, %c0_44] : memref<4x16x64xbf16, #tpu.memory_space<vmem>>, vector<1x16x64xbf16>
    %68 = vector.shape_cast %67 : vector<1x16x64xbf16> to vector<16x64xbf16>
    %cst_45 = arith.constant dense<0.000000e+00> : vector<8x64xf32>
    %69 = tpu.matmul %66, %68, %cst_45 {dimension_numbers = #tpu.dot_dimension_numbers<[1], [0], [0], [1], [0, 0, 1, 1], [], []>} : vector<8x16xbf16>, vector<16x64xbf16>, vector<8x64xf32> -> vector<8x64xf32>
    %70 = arith.addf %38, %69 : vector<8x64xf32>
    %c2 = arith.constant 2 : index
    %c0_46 = arith.constant 0 : index
    %c0_47 = arith.constant 0 : index
    %71 = vector.load %arg4[%c2, %c0_46, %c0_47] : memref<4x64x16xbf16, #tpu.memory_space<vmem>>, vector<1x64x16xbf16>
    %72 = vector.shape_cast %71 : vector<1x64x16xbf16> to vector<64x16xbf16>
    %cst_48 = arith.constant dense<0.000000e+00> : vector<8x16xf32>
    %73 = tpu.matmul %2, %72, %cst_48 {dimension_numbers = #tpu.dot_dimension_numbers<[1], [0], [0], [1], [0, 0, 1, 1], [], []>} : vector<8x64xbf16>, vector<64x16xbf16>, vector<8x16xf32> -> vector<8x16xf32>
    %c2_49 = arith.constant 2 : index
    %c0_50 = arith.constant 0 : index
    %c0_51 = arith.constant 0 : index
    %74 = vector.load %arg5[%c2_49, %c0_50, %c0_51] : memref<4x64x16xbf16, #tpu.memory_space<vmem>>, vector<1x64x16xbf16>
    %75 = vector.shape_cast %74 : vector<1x64x16xbf16> to vector<64x16xbf16>
    %cst_52 = arith.constant dense<0.000000e+00> : vector<16x16xf32>
    %76 = tpu.matmul %5, %75, %cst_52 {dimension_numbers = #tpu.dot_dimension_numbers<[1], [0], [0], [1], [0, 0, 1, 1], [], []>} : vector<16x64xbf16>, vector<64x16xbf16>, vector<16x16xf32> -> vector<16x16xf32>
    %c2_53 = arith.constant 2 : index
    %c0_54 = arith.constant 0 : index
    %c0_55 = arith.constant 0 : index
    %77 = vector.load %arg6[%c2_53, %c0_54, %c0_55] : memref<4x64x16xbf16, #tpu.memory_space<vmem>>, vector<1x64x16xbf16>
    %78 = vector.shape_cast %77 : vector<1x64x16xbf16> to vector<64x16xbf16>
    %cst_56 = arith.constant dense<0.000000e+00> : vector<16x16xf32>
    %79 = tpu.matmul %5, %78, %cst_56 {dimension_numbers = #tpu.dot_dimension_numbers<[1], [0], [0], [1], [0, 0, 1, 1], [], []>} : vector<16x64xbf16>, vector<64x16xbf16>, vector<16x16xf32> -> vector<16x16xf32>
    %80 = arith.truncf %73 : vector<8x16xf32> to vector<8x16xbf16>
    %81 = arith.truncf %76 : vector<16x16xf32> to vector<16x16xbf16>
    %cst_57 = arith.constant dense<0.000000e+00> : vector<8x16xf32>
    %82 = tpu.matmul %80, %81, %cst_57 {dimension_numbers = #tpu.dot_dimension_numbers<[1], [1], [0], [0], [0, 0, 1, 0], [], []>} : vector<8x16xbf16>, vector<16x16xbf16>, vector<8x16xf32> -> vector<8x16xf32>
    %cst_58 = arith.constant 2.500000e-01 : f32
    %83 = vector.broadcast %cst_58 : f32 to vector<8x16xf32>
    %84 = arith.mulf %82, %83 : vector<8x16xf32>
    %cst_59 = arith.constant dense<0xFF800000> : vector<8xf32>
    %85 = vector.multi_reduction <maximumf>, %84, %cst_59 [1] : vector<8x16xf32> to vector<8xf32>
    %86 = vector.shape_cast %85 : vector<8xf32> to vector<8x1xf32>
    %87 = vector.broadcast %86 : vector<8x1xf32> to vector<8x16xf32>
    %88 = arith.subf %84, %87 : vector<8x16xf32>
    %89 = math.exp %88 : vector<8x16xf32>
    %cst_60 = arith.constant dense<0.000000e+00> : vector<8xf32>
    %90 = vector.multi_reduction <add>, %89, %cst_60 [1] : vector<8x16xf32> to vector<8xf32>
    %91 = vector.shape_cast %90 : vector<8xf32> to vector<8x1xf32>
    %92 = tpu.reciprocal %91 {approx = true} : vector<8x1xf32> -> vector<8x1xf32>
    %93 = vector.broadcast %92 : vector<8x1xf32> to vector<8x16xf32>
    %94 = arith.mulf %89, %93 : vector<8x16xf32>
    %95 = arith.truncf %94 : vector<8x16xf32> to vector<8x16xbf16>
    %96 = arith.truncf %79 : vector<16x16xf32> to vector<16x16xbf16>
    %cst_61 = arith.constant dense<0.000000e+00> : vector<8x16xf32>
    %97 = tpu.matmul %95, %96, %cst_61 {dimension_numbers = #tpu.dot_dimension_numbers<[1], [0], [0], [1], [0, 0, 1, 1], [], []>} : vector<8x16xbf16>, vector<16x16xbf16>, vector<8x16xf32> -> vector<8x16xf32>
    %98 = arith.truncf %97 : vector<8x16xf32> to vector<8x16xbf16>
    %c2_62 = arith.constant 2 : index
    %c0_63 = arith.constant 0 : index
    %c0_64 = arith.constant 0 : index
    %99 = vector.load %arg7[%c2_62, %c0_63, %c0_64] : memref<4x16x64xbf16, #tpu.memory_space<vmem>>, vector<1x16x64xbf16>
    %100 = vector.shape_cast %99 : vector<1x16x64xbf16> to vector<16x64xbf16>
    %cst_65 = arith.constant dense<0.000000e+00> : vector<8x64xf32>
    %101 = tpu.matmul %98, %100, %cst_65 {dimension_numbers = #tpu.dot_dimension_numbers<[1], [0], [0], [1], [0, 0, 1, 1], [], []>} : vector<8x16xbf16>, vector<16x64xbf16>, vector<8x64xf32> -> vector<8x64xf32>
    %102 = arith.addf %70, %101 : vector<8x64xf32>
    %c3 = arith.constant 3 : index
    %c0_66 = arith.constant 0 : index
    %c0_67 = arith.constant 0 : index
    %103 = vector.load %arg4[%c3, %c0_66, %c0_67] : memref<4x64x16xbf16, #tpu.memory_space<vmem>>, vector<1x64x16xbf16>
    %104 = vector.shape_cast %103 : vector<1x64x16xbf16> to vector<64x16xbf16>
    %cst_68 = arith.constant dense<0.000000e+00> : vector<8x16xf32>
    %105 = tpu.matmul %2, %104, %cst_68 {dimension_numbers = #tpu.dot_dimension_numbers<[1], [0], [0], [1], [0, 0, 1, 1], [], []>} : vector<8x64xbf16>, vector<64x16xbf16>, vector<8x16xf32> -> vector<8x16xf32>
    %c3_69 = arith.constant 3 : index
    %c0_70 = arith.constant 0 : index
    %c0_71 = arith.constant 0 : index
    %106 = vector.load %arg5[%c3_69, %c0_70, %c0_71] : memref<4x64x16xbf16, #tpu.memory_space<vmem>>, vector<1x64x16xbf16>
    %107 = vector.shape_cast %106 : vector<1x64x16xbf16> to vector<64x16xbf16>
    %cst_72 = arith.constant dense<0.000000e+00> : vector<16x16xf32>
    %108 = tpu.matmul %5, %107, %cst_72 {dimension_numbers = #tpu.dot_dimension_numbers<[1], [0], [0], [1], [0, 0, 1, 1], [], []>} : vector<16x64xbf16>, vector<64x16xbf16>, vector<16x16xf32> -> vector<16x16xf32>
    %c3_73 = arith.constant 3 : index
    %c0_74 = arith.constant 0 : index
    %c0_75 = arith.constant 0 : index
    %109 = vector.load %arg6[%c3_73, %c0_74, %c0_75] : memref<4x64x16xbf16, #tpu.memory_space<vmem>>, vector<1x64x16xbf16>
    %110 = vector.shape_cast %109 : vector<1x64x16xbf16> to vector<64x16xbf16>
    %cst_76 = arith.constant dense<0.000000e+00> : vector<16x16xf32>
    %111 = tpu.matmul %5, %110, %cst_76 {dimension_numbers = #tpu.dot_dimension_numbers<[1], [0], [0], [1], [0, 0, 1, 1], [], []>} : vector<16x64xbf16>, vector<64x16xbf16>, vector<16x16xf32> -> vector<16x16xf32>
    %112 = arith.truncf %105 : vector<8x16xf32> to vector<8x16xbf16>
    %113 = arith.truncf %108 : vector<16x16xf32> to vector<16x16xbf16>
    %cst_77 = arith.constant dense<0.000000e+00> : vector<8x16xf32>
    %114 = tpu.matmul %112, %113, %cst_77 {dimension_numbers = #tpu.dot_dimension_numbers<[1], [1], [0], [0], [0, 0, 1, 0], [], []>} : vector<8x16xbf16>, vector<16x16xbf16>, vector<8x16xf32> -> vector<8x16xf32>
    %cst_78 = arith.constant 2.500000e-01 : f32
    %115 = vector.broadcast %cst_78 : f32 to vector<8x16xf32>
    %116 = arith.mulf %114, %115 : vector<8x16xf32>
    %cst_79 = arith.constant dense<0xFF800000> : vector<8xf32>
    %117 = vector.multi_reduction <maximumf>, %116, %cst_79 [1] : vector<8x16xf32> to vector<8xf32>
    %118 = vector.shape_cast %117 : vector<8xf32> to vector<8x1xf32>
    %119 = vector.broadcast %118 : vector<8x1xf32> to vector<8x16xf32>
    %120 = arith.subf %116, %119 : vector<8x16xf32>
    %121 = math.exp %120 : vector<8x16xf32>
    %cst_80 = arith.constant dense<0.000000e+00> : vector<8xf32>
    %122 = vector.multi_reduction <add>, %121, %cst_80 [1] : vector<8x16xf32> to vector<8xf32>
    %123 = vector.shape_cast %122 : vector<8xf32> to vector<8x1xf32>
    %124 = tpu.reciprocal %123 {approx = true} : vector<8x1xf32> -> vector<8x1xf32>
    %125 = vector.broadcast %124 : vector<8x1xf32> to vector<8x16xf32>
    %126 = arith.mulf %121, %125 : vector<8x16xf32>
    %127 = arith.truncf %126 : vector<8x16xf32> to vector<8x16xbf16>
    %128 = arith.truncf %111 : vector<16x16xf32> to vector<16x16xbf16>
    %cst_81 = arith.constant dense<0.000000e+00> : vector<8x16xf32>
    %129 = tpu.matmul %127, %128, %cst_81 {dimension_numbers = #tpu.dot_dimension_numbers<[1], [0], [0], [1], [0, 0, 1, 1], [], []>} : vector<8x16xbf16>, vector<16x16xbf16>, vector<8x16xf32> -> vector<8x16xf32>
    %130 = arith.truncf %129 : vector<8x16xf32> to vector<8x16xbf16>
    %c3_82 = arith.constant 3 : index
    %c0_83 = arith.constant 0 : index
    %c0_84 = arith.constant 0 : index
    %131 = vector.load %arg7[%c3_82, %c0_83, %c0_84] : memref<4x16x64xbf16, #tpu.memory_space<vmem>>, vector<1x16x64xbf16>
    %132 = vector.shape_cast %131 : vector<1x16x64xbf16> to vector<16x64xbf16>
    %cst_85 = arith.constant dense<0.000000e+00> : vector<8x64xf32>
    %133 = tpu.matmul %130, %132, %cst_85 {dimension_numbers = #tpu.dot_dimension_numbers<[1], [0], [0], [1], [0, 0, 1, 1], [], []>} : vector<8x16xbf16>, vector<16x64xbf16>, vector<8x64xf32> -> vector<8x64xf32>
    %134 = arith.addf %102, %133 : vector<8x64xf32>
    %c0_86 = arith.constant 0 : index
    %c0_87 = arith.constant 0 : index
    %135 = vector.load %arg8[%c0_86, %c0_87] : memref<1x64xf32, #tpu.memory_space<vmem>>, vector<1x64xf32>
    %136 = vector.broadcast %135 : vector<1x64xf32> to vector<8x64xf32>
    %137 = arith.addf %134, %136 : vector<8x64xf32>
    %c0_88 = arith.constant 0 : index
    %c0_89 = arith.constant 0 : index
    %c0_90 = arith.constant 0 : index
    %138 = vector.load %arg9[%c0_88, %c0_89, %c0_90] : memref<1x8x64xf32, #tpu.memory_space<vmem>>, vector<1x8x64xf32>
    %139 = vector.shape_cast %138 : vector<1x8x64xf32> to vector<8x64xf32>
    %140 = vector.shape_cast %137 : vector<8x64xf32> to vector<1x8x64xf32>
    tpu.vector_store %arg9[%c0_88, %c0_89, %c0_90], %140 {strides = array<i32>} : memref<1x8x64xf32, #tpu.memory_space<vmem>>, vector<1x8x64xf32>,
    return
  }
  func.func @transform_0(%arg0: i32, %arg1: i32) -> (i32, i32, i32) {
    %c0_i32 = arith.constant 0 : i32
    %c0_i32_0 = arith.constant 0 : i32
    return %arg0, %arg1, %c0_i32 : i32, i32, i32
  }
  func.func @transform_1(%arg0: i32, %arg1: i32) -> (i32, i32, i32) {
    %c0_i32 = arith.constant 0 : i32
    %c0_i32_0 = arith.constant 0 : i32
    %c0_i32_1 = arith.constant 0 : i32
    return %arg0, %c0_i32, %c0_i32_0 : i32, i32, i32
  }
  func.func @transform_2(%arg0: i32, %arg1: i32) -> (i32, i32, i32) {
    %c0_i32 = arith.constant 0 : i32
    %c0_i32_0 = arith.constant 0 : i32
    %c0_i32_1 = arith.constant 0 : i32
    %c0_i32_2 = arith.constant 0 : i32
    return %c0_i32, %c0_i32_0, %c0_i32_1 : i32, i32, i32
  }
  func.func @transform_3(%arg0: i32, %arg1: i32) -> (i32, i32, i32) {
    %c0_i32 = arith.constant 0 : i32
    %c0_i32_0 = arith.constant 0 : i32
    %c0_i32_1 = arith.constant 0 : i32
    %c0_i32_2 = arith.constant 0 : i32
    return %c0_i32, %c0_i32_0, %c0_i32_1 : i32, i32, i32
  }
  func.func @transform_4(%arg0: i32, %arg1: i32) -> (i32, i32, i32) {
    %c0_i32 = arith.constant 0 : i32
    %c0_i32_0 = arith.constant 0 : i32
    %c0_i32_1 = arith.constant 0 : i32
    %c0_i32_2 = arith.constant 0 : i32
    return %c0_i32, %c0_i32_0, %c0_i32_1 : i32, i32, i32
  }
  func.func @transform_5(%arg0: i32, %arg1: i32) -> (i32, i32, i32) {
    %c0_i32 = arith.constant 0 : i32
    %c0_i32_0 = arith.constant 0 : i32
    %c0_i32_1 = arith.constant 0 : i32
    %c0_i32_2 = arith.constant 0 : i32
    return %c0_i32, %c0_i32_0, %c0_i32_1 : i32, i32, i32
  }
  func.func @transform_6(%arg0: i32, %arg1: i32) -> (i32, i32) {
    %c0_i32 = arith.constant 0 : i32
    %c0_i32_0 = arith.constant 0 : i32
    %c0_i32_1 = arith.constant 0 : i32
    return %c0_i32, %c0_i32_0 : i32, i32
  }
  func.func @transform_7(%arg0: i32, %arg1: i32) -> (i32, i32, i32) {
    %c0_i32 = arith.constant 0 : i32
    %c0_i32_0 = arith.constant 0 : i32
    return %arg0, %arg1, %c0_i32 : i32, i32, i32
  }
}

</mosaic_0001>

<bundles_post_ra>
// kernel: tpu_custom_call.1
= control target key start
LH: loop header
LB: loop body
LE: loop exit
PB: predicated region body
PF: predicated region fallthrough
CT: control target
= control target key end

     0   :  { %12 = vsyncpa [#allocation3], 0  ;;  %s3116_s0 = inlined_call_operand.vmem [shape: f32[2,8,64], index: 0, kind: input, shape index: {}]   ;;  %s3117_s1 = inlined_call_operand.vmem [shape: f32[2,16,64], index: 1, kind: input, shape index: {}]   ;;  %s3118_s2 = inlined_call_operand.vmem [shape: bf16[4,64,16], index: 2, kind: input, shape index: {}]   ;;  %s3119_s3 = inlined_call_operand.vmem [shape: bf16[4,64,16], index: 3, kind: input, shape index: {}]   ;;  %s3120_s4 = inlined_call_operand.vmem [shape: bf16[4,64,16], index: 4, kind: input, shape index: {}]   ;;  %s3121_s5 = inlined_call_operand.vmem [shape: bf16[4,16,64], index: 5, kind: input, shape index: {}]   ;;  %s3122_s6 = inlined_call_operand.vmem [shape: f32[1,64], index: 6, kind: input, shape index: {}]   ;;  %s3123_s7 = inlined_call_operand.hbm [shape: f32[2,8,64], index: 7, kind: output, shape index: {}]  }
   0x1   :  { %14 = vsyncpa [#allocation3 + $0x1], 0  ;;  %s2669_s24 = smov 0   ;;  %s2671_s25 = smov 0  }
   0x2   :  { %s2673_s26 = smov 0   ;;  %s2675_s27 = smov 0  }
   0x3   :  { %s2677_s28 = smov 0   ;;  %s2679_s29 = smov 0  }
   0x4 LB: > { %s1954_s30 = sadd.s32 4294967295, %s2624_s29   ;;  %s1955_s8 = sadd.s32 4294967294, %s2624_s29   ;;  %s2624_s29 = sphi %s2679_s29, %s20_s29   ;;  %s2620_s28 = sphi %s2677_s28, %s3130_s28   ;;  %s2616_s27 = sphi %s2675_s27, %s3129_s27   ;;  %s2612_s26 = sphi %s2673_s26, %s3128_s26   ;;  %s2608_s25 = sphi %s2671_s25, %s3127_s25   ;;  %s2604_s24 = sphi %s2669_s24, %s3126_s24  }
   0x5   : > { %s32_s9 = sadd.s32 1, %s2620_s28  ;;  %s200_s10 = sadd.s32 1, %s2612_s26 }
   0x6   : > { %p34_p0 = scmp.ge.s32.totalorder %s32_s9, 2  ;;  %p210_p1 = scmp.ne.s32.totalorder %s2612_s26, %s2608_s25 }
   0x7   : > { %p211_p2 = scmp.eq.s32.totalorder %s1954_s30, 1  ;;  %p216_p3 = scmp.ne.s32.totalorder %s2608_s25, %s2604_s24 }
   0x8   : > { %s3132_s9 = smov (%p34_p0, %s32_s9), 0  ;;  %p217_p5 = scmp.eq.s32.totalorder %s1955_s8, 1 }
   0x9   : > { %p2709_p4 = por %p211_p2, %p210_p1  ;;  %s195_s12 = ssub.s32 %s2620_s28, %s3132_s9 }
   0xa   : > { %p1958_p6 = scmp.ge.s32.totalorder %s2624_s29, 1  ;;  %p198_p7 = scmp.eq.s32.totalorder %s195_s12, 0 }
   0xb   : > { %p2716_p8 = por %p217_p5, %p216_p3  ;;  %p268_p9 = scmp.lt.s32.totalorder %s2624_s29, 3 }
   0xc   : > { %s2722_s14 = scalar_select %p198_p7, %s2612_s26, %s200_s10  }
   0xd   : > { %p269_p10 = pnand %p1958_p6, %p268_p9 }
   0xe   : > { %p307_p11 = scmp.lt.s32.totalorder (!%p269_p10), %s2616_s27, 1  ;;  %s2119_s15 = sshll.u32 (!%p269_p10), %s2616_s27, 7 }
   0xf   : > { %272 = sbr.rel (%p269_p10) target bundleno = 3733 (0xe95), region = 48  ;;  %s3069_s20 = scalar_lea.hbm (!%p269_p10), %s3123_s7, %s2119_s15 }
  0x10   : > { %s2628_s22 = smov (!%p269_p10), [#allocation2]  }
  0x11   : > { %s2552_s30 = sshll.u32 (!%p269_p10), %s2628_s22, 4  ;;  %s2553_s30 = int_to_ptr.vmem [resolvable:$false] %s2552_s30 }
  0x14   : > { %v2480_v0 = vld [vmem:[%s3119_s3 + $0x18] sm:$0xff]   ;;  %v2626_v1 = vmov 0.0   ;;  %v2481_v2 = vld [vmem:[%s3119_s3 + $0x10] sm:$0xff]   ;;  %vm2627_vm0 = vmmov 0   ;;  %s308_s23 = scalar_select %p307_p11, %s2616_s27, 1  ;;  %v2483_v5 = vld [vmem:[%s3119_s3 + $0x8] sm:$0xff]  }
  0x15   : > { %2219 = vmatprep.subr.bf16.mxu1 %v2626_v1  ;;  %2207 = vmatprep.subr.bf16.mxu0 %v2626_v1  ;;  %v2482_v3 = vld [vmem:[%s3118_s2 + $0x18] sm:$0xff]   ;;  %v2484_v4 = vld [vmem:[%s3118_s2 + $0x10] sm:$0xff]   ;;  %v2485_v6 = vld [vmem:[%s3119_s3] sm:$0xff]   ;;  %vm357_vm1 = vcmask 523264   ;;  %vm552_vm2 = vcmask 130048  }
  0x16   : > { %2220 = vmatpush3.bf16.msra.mxu1 %v2480_v0  ;;  %2227 = vmatprep.mubr.msk.bf16.mxu1 %vm2627_vm0, %v2626_v1  ;;  %s2122_s10 = sshll.u32 %s308_s23, 4  ;;  %s1960_s17 = sshll.u32 %s308_s23, 3  ;;  %v2486_v7 = vld [vmem:[%s3118_s2 + $0x8] sm:$0xff]   ;;  %v2487_v10 = vld [vmem:[%s3118_s2] sm:$0xff]   ;;  %v2488_v25 = vld [vmem:[%s3120_s4 + $0x18] sm:$0xff]  }
  0x17   : > { %2221 = vmatprep.subr.bf16.mxu1 %v2626_v1  ;;  %2215 = vmatprep.mubr.msk.bf16.mxu0 %vm2627_vm0, %v2626_v1  ;;  %s318_s16 = scalar_lea.vmem %s3117_s1, %s2122_s10  ;;  %s313_s8 = scalar_lea.vmem %s3116_s0, %s1960_s17  ;;  %v2489_v26 = vld [vmem:[%s3120_s4 + $0x10] sm:$0xff]   ;;  %v2490_v27 = vld [vmem:[%s3120_s4 + $0x8] sm:$0xff]   ;;  %v2491_v28 = vld [vmem:[%s3120_s4] sm:$0xff]  }
  0x18   : > { %2208 = vmatpush3.bf16.msra.mxu0 %v2482_v3  ;;  %v322_v8 = vld [vmem:[%s318_s16] sm:$0xff]  ;;  %v323_v9 = vld [vmem:[%s318_s16 + $0x8] sm:$0xff]  ;;  %v2494_v45 = vld [vmem:[%s3118_s2 + $0x38] sm:$0xff]  }
  0x19   : > { %2209 = vmatprep.subr.bf16.mxu0 %v2626_v1  ;;  %v320_v11 = vld [vmem:[%s313_s8] sm:$0xff]  ;;  %v2767_v12 = vpack.c.bf16 %v323_v9, %v322_v8  ;;  %v2496_v46 = vld [vmem:[%s3118_s2 + $0x30] sm:$0xff]   ;;  %v2498_v47 = vld [vmem:[%s3118_s2 + $0x28] sm:$0xff]   ;;  %s304_s8 = sand.u32 1, %s2608_s25  }
  0x1a   : > { %2222 = vmatpush3.bf16.msra.mxu1 %v2481_v2  ;;  %v2770_v13 = vpack.c.bf16 %v320_v11, %v320_v11  ;;  %v2499_v48 = vld [vmem:[%s3118_s2 + $0x20] sm:$0xff]   ;;  %v2492_v52 = vld [vmem:[%s3119_s3 + $0x38] sm:$0xff]   ;;  %v2493_v54 = vld [vmem:[%s3119_s3 + $0x30] sm:$0xff]   ;;  %s1959_s23 = sshll.u32 %s304_s8, 3  ;;  %s1857_s27 = scalar_lea.sflag [#allocation3], %s304_s8 }
  0x1b   : > { %2223 = vmatprep.subr.bf16.mxu1 %v2626_v1  ;;  %v2495_v55 = vld [vmem:[%s3119_s3 + $0x28] sm:$0xff]   ;;  %v2497_v56 = vld [vmem:[%s3119_s3 + $0x20] sm:$0xff]   ;;  %v2500_v9 = vld [vmem:[%s3120_s4 + $0x38] sm:$0xff]   ;;  %s306_s16 = scalar_lea.vmem [#allocation2], %s1959_s23  ;;  %s2554_s23 = scalar_lea.vmem %s2553_s30, 256 }
  0x1c   : > { %2210 = vmatpush3.bf16.msra.mxu0 %v2484_v4  ;;  %v2502_v11 = vld [vmem:[%s3120_s4 + $0x28] sm:$0xff]   ;;  %s1871_s17 = sshll.u32 %s306_s16, 4  ;;  %s3071_s17 = int_to_ptr.vmem [resolvable:$true] %s1871_s17 }
  0x1d   : > { %2211 = vmatprep.subr.bf16.mxu0 %v2626_v1  ;;  %s2548_s21 = scalar_lea.vmem %s3071_s17, 128  ;;  %p2555_p1 = scmp.lt.s32.totalorder %s3071_s17, %s2553_s30 }
  0x1e   : > { %2224 = vmatpush3.bf16.msra.mxu1 %v2483_v5  ;;  %p2549_p12 = scmp.ne.s32.totalorder %s3071_s17, %s2548_s21  ;;  %p2556_p2 = scmp.lt.s32.totalorder %s2554_s23, %s2548_s21 }
  0x1f   : > { %2225 = vmatprep.subr.bf16.mxu1 %v2626_v1 }
  0x20   : > { %2212 = vmatpush3.bf16.msra.mxu0 %v2486_v7  ;;  %p2550_p13 = pnand %p2549_p12, %p2709_p4  ;;  %p2557_p3 = por %p2556_p2, %p2555_p1 }
  0x21   : > { %2213 = vmatprep.subr.bf16.mxu0 %v2626_v1 }
  0x22   : > { %2226 = vmatpush3.bf16.msra.mxu1 %v2485_v6  ;;  %p2551_p0 = pneg %p2550_p13 }
  0x23   : > { %2243 = vmatprep.subr.bf16.mxu1 %v2626_v1 }
  0x24   : > { %2214 = vmatpush3.bf16.msra.mxu0 %v2487_v10  ;;  %v2501_v10 = vld [vmem:[%s3120_s4 + $0x30] sm:$0xff]   ;;  %p2558_p5 = pnand %p2557_p3, %p2551_p0 }
  0x25   : > { %2228 = vmatmul.mubr.msk.bf16.vlgmr.msra.gmra.mxu1 %vm357_vm1, %v2767_v12  ;;  %2231 = vmatprep.subr.bf16.mxu0 %v2626_v1 }
  0x26   : > { %2245 = vmatprep.mubr.msk.bf16.mxu1 %vm2627_vm0, %v2626_v1 }
  0x27   : > { %2216 = vmatmul.mubr.msk.bf16.vlgmr.msra.gmra.mxu0 %vm357_vm1, %v2770_v13 }
  0x28   : > { %2239 = vmatprep.mubr.msk.bf16.mxu0 %vm2627_vm0, %v2626_v1  ;;  %2232 = vmatpush3.bf16.msra.mxu0 %v2488_v25 }
  0x29   : > { %2233 = vmatprep.subr.bf16.mxu0 %v2626_v1 }
  0x2c   : > { %2234 = vmatpush3.bf16.msra.mxu0 %v2489_v26 }
  0x2d   : > { %2235 = vmatprep.subr.bf16.mxu0 %v2626_v1 }
  0x30   : > { %2236 = vmatpush3.bf16.msra.mxu0 %v2490_v27 }
  0x31   : > { %2237 = vmatprep.subr.bf16.mxu0 %v2626_v1 }
  0x34   : > { %2238 = vmatpush3.bf16.msra.mxu0 %v2491_v28 }
  0x35   : > { %2255 = vmatprep.subr.bf16.mxu0 %v2626_v1 }
  0x37   : > { %2240 = vmatmul.mubr.msk.bf16.vlgmr.msra.gmra.mxu0 %vm357_vm1, %v2767_v12 }
  0x38   : > { %2263 = vmatprep.mubr.msk.bf16.mxu0 %vm2627_vm0, %v2626_v1  ;;  %2256 = vmatpush3.bf16.msra.mxu0 %v2494_v45 }
  0x39   : > { %2257 = vmatprep.subr.bf16.mxu0 %v2626_v1 }
  0x3c   : > { %2258 = vmatpush3.bf16.msra.mxu0 %v2496_v46 }
  0x3d   : > { %2259 = vmatprep.subr.bf16.mxu0 %v2626_v1 }
  0x40   : > { %2260 = vmatpush3.bf16.msra.mxu0 %v2498_v47  ;;  %v2511_v47 = vld [vmem:[%s3118_s2 + $0x50] sm:$0xff]  }
  0x41   : > { %2261 = vmatprep.subr.bf16.mxu0 %v2626_v1 }
  0x44   : > { %2262 = vmatpush3.bf16.msra.mxu0 %v2499_v48 }
  0x45   : > { %2279 = vmatprep.subr.bf16.mxu0 %v2626_v1 }
  0x47   : > { %2264 = vmatmul.mubr.msk.bf16.vlgmr.msra.gmra.mxu0 %vm357_vm1, %v2770_v13 }
  0x48   : > { %2287 = vmatprep.mubr.msk.bf16.mxu0 %vm2627_vm0, %v2626_v1  ;;  %2280 = vmatpush3.bf16.msra.mxu0 %v2500_v9  ;;  %v2516_v9 = vld [vmem:[%s3120_s4 + $0x48] sm:$0xff]  }
  0x49   : > { %2281 = vmatprep.subr.bf16.mxu0 %v2626_v1 }
  0x4c   : > { %2282 = vmatpush3.bf16.msra.mxu0 %v2501_v10  ;;  %v2517_v10 = vld [vmem:[%s3120_s4 + $0x40] sm:$0xff]  }
  0x4d   : > { %2283 = vmatprep.subr.bf16.mxu0 %v2626_v1 }
  0x50   : > { %2284 = vmatpush3.bf16.msra.mxu0 %v2502_v11 }
  0x51   : > { %2285 = vmatprep.subr.bf16.mxu0 %v2626_v1 }
  0xe5   : > { %v470_v14 = vpop.f32.mrf.mxu1 }
  0xe7   : > { %v2229_v15 = vpop.f32.mrf.mxu1  ;;  %v395_v16 = vpop.f32.mrf.mxu0 }
  0xe8   : > { %v550_v24 = vpack.c.bf16 %v395_v16, %v395_v16 }
  0xe9   : > { %v473_v17 = vpop.f32.mrf.mxu1  ;;  %v2217_v18 = vpop.f32.mrf.mxu0 }
  0xea   : > { %v551_v19 = vpack.c.bf16 %v473_v17, %v470_v14  ;;  %v2503_v14 = vld [vmem:[%s3120_s4 + $0x20] sm:$0xff]  }
  0xeb   : > { %v2230_v20 = vpop.f32.mrf.mxu1  ;;  %v398_v21 = vpop.f32.mrf.mxu0  ;;  %2286 = vmatpush3.bf16.msra.mxu0 %v2503_v14 }
  0xec   : > { %v557_v22 = vsel %vm552_vm2, %v551_v19, 0  ;;  %2303 = vmatprep.subr.bf16.mxu0 %v2626_v1 }
  0xed   : > { %2244 = vmatpush3.bf16.xpose.msra.mxu1 %v557_v22  ;;  %v2218_v23 = vpop.f32.mrf.mxu0 }
  0xee   : > { %2249 = vmatprep.subr.bf16.mxu1 %v2626_v1  ;;  %2288 = vmatmul.mubr.msk.bf16.vlgmr.msra.gmra.mxu0 %vm357_vm1, %v2767_v12 }
  0xef   : > { %2305 = vmatprep.mubr.msk.bf16.mxu0 %vm2627_vm0, %v2626_v1 }
  0xf4   : > { %2246 = vmatmul.mubr.msk.bf16.vlgmr.msra.gmra.mxu1 %vm552_vm2, %v550_v24 }
  0xf5   : > { %2251 = vmatprep.mubr.msk.bf16.mxu1 %vm2627_vm0, %v2626_v1 }
  0xf7   : > { %v543_v35 = vpop.f32.mrf.mxu0 }
  0xf9   : > { %v2241_v36 = vpop.f32.mrf.mxu0 }
  0xfb   : > { %v546_v42 = vpop.f32.mrf.mxu0 }
  0xfc   : > { %v612_v43 = vpack.c.bf16 %v546_v42, %v543_v35  ;;  %v2504_v35 = vld [vmem:[%s3121_s5] sm:$0xff]  }
  0xfd   : > { %v2242_v44 = vpop.f32.mrf.mxu0 }
  0xfe   : > { %2250 = vmatpush3.bf16.msra.mxu1 %v612_v43  ;;  %v2510_v43 = vld [vmem:[%s3118_s2 + $0x58] sm:$0xff]  }
  0xff   : > { %2267 = vmatprep.subr.bf16.mxu1 %v2626_v1 }
 0x107   : > { %v726_v57 = vpop.f32.mrf.mxu0 }
 0x108   : > { %v880_v8 = vpack.c.bf16 %v726_v57, %v726_v57 }
 0x109   : > { %v2265_v58 = vpop.f32.mrf.mxu0 }
 0x10b   : > { %v729_v59 = vpop.f32.mrf.mxu0 }
 0x10d   : > { %v2266_v60 = vpop.f32.mrf.mxu0 }
 0x1ae   : > { %v873_v21 = vpop.f32.mrf.mxu0 }
 0x1b0   : > { %v2289_v22 = vpop.f32.mrf.mxu0 }
 0x1b2   : > { %v876_v28 = vpop.f32.mrf.mxu0 }
 0x1b4   : > { %v593_v29 = vpop.f32.mrf.mxu1 }
 0x1b5   : > { %v599_v30 = vmul.f32 0.25, %v593_v29  ;;  %v941_v29 = vpack.c.bf16 %v876_v28, %v873_v21 }
 0x1b6   : > { %v2247_v31 = vpop.f32.mrf.mxu1 }
 0x1b7   : > { %v600_v32 = vsel %vm552_vm2, %v599_v30, -inf  ;;  %v2508_v31 = vld [vmem:[%s3121_s5 + $0x8] sm:$0xff]  }
 0x1b8   : > { %601 = vmax.xlane.f32.xlu0 %v600_v32  ;;  %v596_v33 = vpop.f32.mrf.mxu1  ;;  %2304 = vmatpush3.bf16.msra.mxu0 %v2508_v31 }
 0x1b9   : > { %2315 = vmatprep.subr.bf16.mxu0 %v2626_v1 }
 0x1ba   : > { %v2248_v34 = vpop.f32.mrf.mxu1 }
 0x241   : > { %v602_v37 = vpop.xlane.xlu0 %601 }
 0x242   : > { %v603_v38 = vsub.f32 %v599_v30, %v602_v37  ;;  %v2290_v30 = vpop.f32.mrf.mxu0  ;;  %v2505_v37 = vld [vmem:[%s3119_s3 + $0x58] sm:$0xff]  }
 0x244   : > { %v604_v39 = vmul.f32 1.442695, %v603_v38 }
 0x246   : > { %2532 = vpow2.f32 %v604_v39  ;;  %v2506_v39 = vld [vmem:[%s3119_s3 + $0x50] sm:$0xff]  }
 0x253   : > { %v2533_v40 = vpop.eup %2532 }
 0x254   : > { %v606_v41 = vsel %vm552_vm2, %v2533_v40, 0.0 }
 0x255   : > { %607 = vadd.xlane.f32.xlu0 %v606_v41  ;;  %v2509_v41 = vld [vmem:[%s3119_s3 + $0x40] sm:$0xff]  }
 0x2de   : > { %v608_v49 = vpop.xlane.xlu0 %607 }
 0x2df   : > { %2534 = vrcp.f32 %v608_v49 }
 0x2ec   : > { %v2535_v50 = vpop.eup %2534 }
 0x2ed   : > { %v610_v51 = vmul.f32 %v2535_v50, %v2533_v40  ;;  %v2507_v40 = vld [vmem:[%s3119_s3 + $0x48] sm:$0xff]  }
 0x2ee   : > { %v2512_v50 = vld [vmem:[%s3118_s2 + $0x48] sm:$0xff]  }
 0x2ef   : > { %v611_v53 = vpack.c.bf16 %v610_v51, %v610_v51 }
 0x2f1   : > { %2252 = vmatmul.mubr.msk.bf16.vlgmr.msra.gmra.mxu1 %vm552_vm2, %v611_v53  ;;  %v2513_v53 = vld [vmem:[%s3118_s2 + $0x40] sm:$0xff]  }
 0x2f2   : > { %2268 = vmatpush3.bf16.msra.mxu1 %v2492_v52  ;;  %2275 = vmatprep.mubr.msk.bf16.mxu1 %vm2627_vm0, %v2626_v1 }
 0x2f3   : > { %2269 = vmatprep.subr.bf16.mxu1 %v2626_v1 }
 0x2f6   : > { %2270 = vmatpush3.bf16.msra.mxu1 %v2493_v54 }
 0x2f7   : > { %2271 = vmatprep.subr.bf16.mxu1 %v2626_v1 }
 0x2fa   : > { %2272 = vmatpush3.bf16.msra.mxu1 %v2495_v55 }
 0x2fb   : > { %2273 = vmatprep.subr.bf16.mxu1 %v2626_v1 }
 0x2fe   : > { %2274 = vmatpush3.bf16.msra.mxu1 %v2497_v56 }
 0x2ff   : > { %2291 = vmatprep.subr.bf16.mxu1 %v2626_v1 }
 0x301   : > { %2276 = vmatmul.mubr.msk.bf16.vlgmr.msra.gmra.mxu1 %vm357_vm1, %v2767_v12 }
 0x302   : > { %2293 = vmatprep.mubr.msk.bf16.mxu1 %vm2627_vm0, %v2626_v1 }
 0x3b1   : > { %v2853_v61 = vpop.f32.mrf.mxu1 }
 0x3b2   : > { %v656_v38 = vpack.c.bf16 %v2853_v61, %v2853_v61 }
 0x3b3   : > { %v2253_v62 = vpop.f32.mrf.mxu1 }
 0x3b5   : > { %v653_v63 = vpop.f32.mrf.mxu1 }
 0x3b7   : > { %v2254_v0 = vpop.f32.mrf.mxu1 }
 0x3c1   : > { %v799_v2 = vpop.f32.mrf.mxu1 }
 0x3c3   : > { %v2277_v3 = vpop.f32.mrf.mxu1 }
 0x3c5   : > { %v802_v4 = vpop.f32.mrf.mxu1 }
 0x3c6   : > { %v881_v5 = vpack.c.bf16 %v802_v4, %v799_v2 }
 0x3c7   : > { %v2278_v6 = vpop.f32.mrf.mxu1 }
 0x3c8   : > { %v886_v7 = vsel %vm552_vm2, %v881_v5, 0 }
 0x3c9   : > { %2292 = vmatpush3.bf16.xpose.msra.mxu1 %v886_v7  ;;  %v2514_v7 = vld [vmem:[%s3120_s4 + $0x58] sm:$0xff]  }
 0x3ca   : > { %2297 = vmatprep.subr.bf16.mxu1 %v2626_v1 }
 0x3d0   : > { %2294 = vmatmul.mubr.msk.bf16.vlgmr.msra.gmra.mxu1 %vm552_vm2, %v880_v8  ;;  %v2515_v8 = vld [vmem:[%s3120_s4 + $0x50] sm:$0xff]  }
 0x3d1   : > { %2299 = vmatprep.mubr.msk.bf16.mxu1 %vm2627_vm0, %v2626_v1  ;;  %2298 = vmatpush3.bf16.msra.mxu1 %v941_v29  ;;  %v2518_v29 = vld [vmem:[%s3121_s5 + $0x10] sm:$0xff]  }
 0x3d2   : > { %2309 = vmatprep.subr.bf16.mxu1 %v2626_v1 }
 0x490   : > { %v922_v15 = vpop.f32.mrf.mxu1 }
 0x491   : > { %v928_v16 = vmul.f32 0.25, %v922_v15 }
 0x492   : > { %v2295_v17 = vpop.f32.mrf.mxu1 }
 0x493   : > { %v929_v18 = vsel %vm552_vm2, %v928_v16, -inf }
 0x494   : > { %930 = vmax.xlane.f32.xlu1 %v929_v18  ;;  %v925_v19 = vpop.f32.mrf.mxu1 }
 0x496   : > { %v2296_v20 = vpop.f32.mrf.mxu1 }
 0x51d   : > { %v931_v23 = vpop.xlane.xlu1 %930 }
 0x51e   : > { %v932_v24 = vsub.f32 %v928_v16, %v931_v23 }
 0x520   : > { %v933_v25 = vmul.f32 1.442695, %v932_v24 }
 0x522   : > { %2536 = vpow2.f32 %v933_v25 }
 0x52f   : > { %v2537_v26 = vpop.eup %2536 }
 0x530   : > { %v935_v27 = vsel %vm552_vm2, %v2537_v26, 0.0 }
 0x531   : > { %936 = vadd.xlane.f32.xlu1 %v935_v27 }
 0x5ba   : > { %v937_v32 = vpop.xlane.xlu1 %936 }
 0x5bb   : > { %2538 = vrcp.f32 %v937_v32 }
 0x5c8   : > { %v2539_v33 = vpop.eup %2538 }
 0x5c9   : > { %v939_v34 = vmul.f32 %v2539_v33, %v2537_v26 }
 0x5cb   : > { %v940_v36 = vpack.c.bf16 %v939_v34, %v939_v34  ;;  %v2521_v34 = vld [vmem:[%s3118_s2 + $0x78] sm:$0xff]  }
 0x5cd   : > { %2300 = vmatmul.mubr.msk.bf16.vlgmr.msra.gmra.mxu1 %vm552_vm2, %v940_v36  ;;  %v2525_v36 = vld [vmem:[%s3118_s2 + $0x68] sm:$0xff]  }
 0x5ce   : > { %2310 = vmatpush3.bf16.msra.mxu1 %v2504_v35  ;;  %2311 = vmatprep.mubr.msk.bf16.mxu1 %vm2627_vm0, %v2626_v1  ;;  %v2523_v35 = vld [vmem:[%s3118_s2 + $0x70] sm:$0xff]  }
 0x5cf   : > { %2327 = vmatprep.subr.bf16.mxu1 %v2626_v1 }
 0x5d5   : > { %2312 = vmatmul.mubr.msk.bf16.vlgmr.msra.gmra.mxu1 %vm552_vm2, %v656_v38 }
 0x5d6   : > { %2328 = vmatpush3.bf16.msra.mxu1 %v2505_v37  ;;  %2335 = vmatprep.mubr.msk.bf16.mxu1 %vm2627_vm0, %v2626_v1  ;;  %v2526_v37 = vld [vmem:[%s3118_s2 + $0x60] sm:$0xff]  }
 0x5d7   : > { %2329 = vmatprep.subr.bf16.mxu1 %v2626_v1 }
 0x5da   : > { %2330 = vmatpush3.bf16.msra.mxu1 %v2506_v39  ;;  %v2519_v39 = vld [vmem:[%s3119_s3 + $0x78] sm:$0xff]  }
 0x5db   : > { %2331 = vmatprep.subr.bf16.mxu1 %v2626_v1 }
 0x5de   : > { %2332 = vmatpush3.bf16.msra.mxu1 %v2507_v40 }
 0x5df   : > { %2333 = vmatprep.subr.bf16.mxu1 %v2626_v1 }
 0x5e2   : > { %2334 = vmatpush3.bf16.msra.mxu1 %v2509_v41 }
 0x5e3   : > { %2351 = vmatprep.subr.bf16.mxu1 %v2626_v1 }
 0x5e5   : > { %2336 = vmatmul.mubr.msk.bf16.vlgmr.msra.gmra.mxu1 %vm357_vm1, %v2767_v12 }
 0x5e6   : > { %2353 = vmatprep.mubr.msk.bf16.mxu1 %vm2627_vm0, %v2626_v1 }
 0x68d   : > { %v979_v42 = vpop.f32.mrf.mxu1 }
 0x68e   : > { %v985_v44 = vpack.c.bf16 %v979_v42, %v979_v42 }
 0x68f   : > { %v2301_v45 = vpop.f32.mrf.mxu1 }
 0x690   : > { %2306 = vmatmul.mubr.msk.bf16.vlgmr.msra.gmra.mxu0 %vm552_vm2, %v985_v44  ;;  %v2522_v44 = vld [vmem:[%s3119_s3 + $0x68] sm:$0xff]   ;;  %v2524_v45 = vld [vmem:[%s3119_s3 + $0x60] sm:$0xff]  }
 0x691   : > { %2316 = vmatpush3.bf16.msra.mxu0 %v2510_v43  ;;  %v982_v46 = vpop.f32.mrf.mxu1  ;;  %2323 = vmatprep.mubr.msk.bf16.mxu0 %vm2627_vm0, %v2626_v1  ;;  %v2520_v43 = vld [vmem:[%s3119_s3 + $0x70] sm:$0xff]  }
 0x692   : > { %2317 = vmatprep.subr.bf16.mxu0 %v2626_v1 }
 0x693   : > { %v2302_v48 = vpop.f32.mrf.mxu1 }
 0x695   : > { %2318 = vmatpush3.bf16.msra.mxu0 %v2511_v47  ;;  %v2929_v49 = vpop.f32.mrf.mxu1 }
 0x696   : > { %2319 = vmatprep.subr.bf16.mxu0 %v2626_v1 }
 0x697   : > { %v2313_v51 = vpop.f32.mrf.mxu1 }
 0x699   : > { %2320 = vmatpush3.bf16.msra.mxu0 %v2512_v50  ;;  %v1084_v52 = vpop.f32.mrf.mxu1 }
 0x69a   : > { %2321 = vmatprep.subr.bf16.mxu0 %v2626_v1 }
 0x69b   : > { %v2314_v54 = vpop.f32.mrf.mxu1 }
 0x69d   : > { %2322 = vmatpush3.bf16.msra.mxu0 %v2513_v53 }
 0x69e   : > { %2339 = vmatprep.subr.bf16.mxu0 %v2626_v1 }
 0x6a0   : > { %2324 = vmatmul.mubr.msk.bf16.vlgmr.msra.gmra.mxu0 %vm357_vm1, %v2770_v13 }
 0x6a1   : > { %2347 = vmatprep.mubr.msk.bf16.mxu0 %vm2627_vm0, %v2626_v1  ;;  %2340 = vmatpush3.bf16.msra.mxu0 %v2514_v7 }
 0x6a2   : > { %2341 = vmatprep.subr.bf16.mxu0 %v2626_v1 }
 0x6a5   : > { %v1227_v55 = vpop.f32.mrf.mxu1  ;;  %2342 = vmatpush3.bf16.msra.mxu0 %v2515_v8 }
 0x6a6   : > { %2343 = vmatprep.subr.bf16.mxu0 %v2626_v1 }
 0x6a7   : > { %v2337_v56 = vpop.f32.mrf.mxu1 }
 0x6a9   : > { %v1230_v57 = vpop.f32.mrf.mxu1  ;;  %2344 = vmatpush3.bf16.msra.mxu0 %v2516_v9 }
 0x6aa   : > { %v1309_v58 = vpack.c.bf16 %v1230_v57, %v1227_v55  ;;  %2345 = vmatprep.subr.bf16.mxu0 %v2626_v1 }
 0x6ab   : > { %v2338_v59 = vpop.f32.mrf.mxu1 }
 0x6ac   : > { %v1314_v60 = vsel %vm552_vm2, %v1309_v58, 0 }
 0x6ad   : > { %2352 = vmatpush3.bf16.xpose.msra.mxu1 %v1314_v60  ;;  %2346 = vmatpush3.bf16.msra.mxu0 %v2517_v10 }
 0x6ae   : > { %2357 = vmatprep.subr.bf16.mxu1 %v2626_v1  ;;  %2363 = vmatprep.subr.bf16.mxu0 %v2626_v1 }
 0x6b0   : > { %2348 = vmatmul.mubr.msk.bf16.vlgmr.msra.gmra.mxu0 %vm357_vm1, %v2767_v12 }
 0x6b1   : > { %2365 = vmatprep.mubr.msk.bf16.mxu0 %vm2627_vm0, %v2626_v1  ;;  %2364 = vmatpush3.bf16.msra.mxu0 %v2518_v29 }
 0x6b2   : > { %2381 = vmatprep.subr.bf16.mxu0 %v2626_v1 }
 0x750   : > { %v2946_v61 = vpop.f32.mrf.mxu0 }
 0x751   : > { %v1082_v51 = vadd.f32 %v2929_v49, %v2946_v61  ;;  %v2527_v49 = vld [vmem:[%s3120_s4 + $0x78] sm:$0xff]   ;;  %v2528_v61 = vld [vmem:[%s3120_s4 + $0x70] sm:$0xff]  }
 0x752   : > { %v2307_v62 = vpop.f32.mrf.mxu0 }
 0x754   : > { %v1035_v63 = vpop.f32.mrf.mxu0 }
 0x756   : > { %v2308_v0 = vpop.f32.mrf.mxu0 }
 0x760   : > { %v1154_v2 = vpop.f32.mrf.mxu0 }
 0x761   : > { %v1308_v3 = vpack.c.bf16 %v1154_v2, %v1154_v2  ;;  %v2529_v2 = vld [vmem:[%s3120_s4 + $0x68] sm:$0xff]  }
 0x762   : > { %v2325_v4 = vpop.f32.mrf.mxu0 }
 0x763   : > { %2354 = vmatmul.mubr.msk.bf16.vlgmr.msra.gmra.mxu1 %vm552_vm2, %v1308_v3  ;;  %v2530_v3 = vld [vmem:[%s3120_s4 + $0x60] sm:$0xff]  }
 0x764   : > { %v1157_v5 = vpop.f32.mrf.mxu0  ;;  %2359 = vmatprep.mubr.msk.bf16.mxu1 %vm2627_vm0, %v2626_v1 }
 0x766   : > { %v2326_v6 = vpop.f32.mrf.mxu0 }
 0x770   : > { %v1301_v19 = vpop.f32.mrf.mxu0 }
 0x772   : > { %v2349_v20 = vpop.f32.mrf.mxu0 }
 0x773   : > { %v2531_v20 = vld [vmem:[%s3121_s5 + $0x18] sm:$0xff]  }
 0x774   : > { %v1304_v26 = vpop.f32.mrf.mxu0 }
 0x775   : > { %v1369_v27 = vpack.c.bf16 %v1304_v26, %v1301_v19 }
 0x776   : > { %v2350_v28 = vpop.f32.mrf.mxu0 }
 0x777   : > { %2358 = vmatpush3.bf16.msra.mxu1 %v1369_v27 }
 0x778   : > { %2369 = vmatprep.subr.bf16.mxu1 %v2626_v1 }
 0x823   : > { %v1350_v11 = vpop.f32.mrf.mxu1 }
 0x824   : > { %v1356_v14 = vmul.f32 0.25, %v1350_v11 }
 0x825   : > { %v2355_v15 = vpop.f32.mrf.mxu1 }
 0x826   : > { %v1357_v16 = vsel %vm552_vm2, %v1356_v14, -inf }
 0x827   : > { %1358 = vmax.xlane.f32.xlu0 %v1357_v16  ;;  %v1353_v17 = vpop.f32.mrf.mxu1 }
 0x829   : > { %v2356_v18 = vpop.f32.mrf.mxu1 }
 0x8b0   : > { %v1359_v21 = vpop.xlane.xlu0 %1358 }
 0x8b1   : > { %v1360_v22 = vsub.f32 %v1356_v14, %v1359_v21 }
 0x8b3   : > { %v1361_v23 = vmul.f32 1.442695, %v1360_v22 }
 0x8b5   : > { %2540 = vpow2.f32 %v1361_v23 }
 0x8c2   : > { %v2541_v24 = vpop.eup %2540 }
 0x8c3   : > { %v1363_v25 = vsel %vm552_vm2, %v2541_v24, 0.0 }
 0x8c4   : > { %1364 = vadd.xlane.f32.xlu1 %v1363_v25 }
 0x94d   : > { %v1365_v30 = vpop.xlane.xlu1 %1364 }
 0x94e   : > { %2542 = vrcp.f32 %v1365_v30 }
 0x95b   : > { %v2543_v31 = vpop.eup %2542 }
 0x95c   : > { %v1367_v32 = vmul.f32 %v2543_v31, %v2541_v24  ;;  %v2117_v31 = vld [vmem:[%s3122_s6] ss:$0 sm:$0xff] }
 0x95e   : > { %v1368_v33 = vpack.c.bf16 %v1367_v32, %v1367_v32 }
 0x960   : > { %2360 = vmatmul.mubr.msk.bf16.vlgmr.msra.gmra.mxu1 %vm552_vm2, %v1368_v33 }
 0x961   : > { %2377 = vmatprep.mubr.msk.bf16.mxu1 %vm2627_vm0, %v2626_v1  ;;  %2370 = vmatpush3.bf16.msra.mxu1 %v2521_v34 }
 0x962   : > { %2371 = vmatprep.subr.bf16.mxu1 %v2626_v1 }
 0x965   : > { %2372 = vmatpush3.bf16.msra.mxu1 %v2523_v35 }
 0x966   : > { %2373 = vmatprep.subr.bf16.mxu1 %v2626_v1 }
 0x969   : > { %2374 = vmatpush3.bf16.msra.mxu1 %v2525_v36 }
 0x96a   : > { %2375 = vmatprep.subr.bf16.mxu1 %v2626_v1 }
 0x96d   : > { %2376 = vmatpush3.bf16.msra.mxu1 %v2526_v37 }
 0x96e   : > { %2393 = vmatprep.subr.bf16.mxu1 %v2626_v1 }
 0x970   : > { %2378 = vmatmul.mubr.msk.bf16.vlgmr.msra.gmra.mxu1 %vm357_vm1, %v2770_v13 }
 0x971   : > { %2401 = vmatprep.mubr.msk.bf16.mxu1 %vm2627_vm0, %v2626_v1  ;;  %2394 = vmatpush3.bf16.msra.mxu1 %v2527_v49 }
 0x972   : > { %2395 = vmatprep.subr.bf16.mxu1 %v2626_v1 }
 0x975   : > { %2396 = vmatpush3.bf16.msra.mxu1 %v2528_v61 }
 0x976   : > { %2397 = vmatprep.subr.bf16.mxu1 %v2626_v1 }
 0x979   : > { %2398 = vmatpush3.bf16.msra.mxu1 %v2529_v2 }
 0x97a   : > { %2399 = vmatprep.subr.bf16.mxu1 %v2626_v1 }
 0x97d   : > { %2400 = vmatpush3.bf16.msra.mxu1 %v2530_v3 }
 0x97e   : > { %2417 = vmatprep.subr.bf16.mxu1 %v2626_v1 }
 0x980   : > { %2402 = vmatmul.mubr.msk.bf16.vlgmr.msra.gmra.mxu1 %vm357_vm1, %v2767_v12 }
 0x981   : > { %2419 = vmatprep.mubr.msk.bf16.mxu1 %vm2627_vm0, %v2626_v1  ;;  %2418 = vmatpush3.bf16.msra.mxu1 %v2531_v20 }
 0xa20   : > { %v1407_v38 = vpop.f32.mrf.mxu1 }
 0xa21   : > { %v1413_v40 = vpack.c.bf16 %v1407_v38, %v1407_v38 }
 0xa22   : > { %v2361_v41 = vpop.f32.mrf.mxu1 }
 0xa23   : > { %2366 = vmatmul.mubr.msk.bf16.vlgmr.msra.gmra.mxu0 %vm552_vm2, %v1413_v40 }
 0xa24   : > { %2382 = vmatpush3.bf16.msra.mxu0 %v2519_v39  ;;  %v1410_v42 = vpop.f32.mrf.mxu1  ;;  %2389 = vmatprep.mubr.msk.bf16.mxu0 %vm2627_vm0, %v2626_v1 }
 0xa25   : > { %2383 = vmatprep.subr.bf16.mxu0 %v2626_v1 }
 0xa26   : > { %v2362_v13 = vpop.f32.mrf.mxu1 }
 0xa28   : > { %2384 = vmatpush3.bf16.msra.mxu0 %v2520_v43 }
 0xa29   : > { %2385 = vmatprep.subr.bf16.mxu0 %v2626_v1 }
 0xa2c   : > { %2386 = vmatpush3.bf16.msra.mxu0 %v2522_v44 }
 0xa2d   : > { %2387 = vmatprep.subr.bf16.mxu0 %v2626_v1 }
 0xa30   : > { %2388 = vmatpush3.bf16.msra.mxu0 %v2524_v45  ;;  %v1534_v46 = vpop.f32.mrf.mxu1 }
 0xa31   : > { %2405 = vmatprep.subr.bf16.mxu0 %v2626_v1  ;;  %v1688_v0 = vpack.c.bf16 %v1534_v46, %v1534_v46 }
 0xa32   : > { %v2379_v47 = vpop.f32.mrf.mxu1 }
 0xa33   : > { %2390 = vmatmul.mubr.msk.bf16.vlgmr.msra.gmra.mxu0 %vm357_vm1, %v2767_v12 }
 0xa34   : > { %2407 = vmatprep.mubr.msk.bf16.mxu0 %vm2627_vm0, %v2626_v1  ;;  %v1537_v48 = vpop.f32.mrf.mxu1 }
 0xa36   : > { %v2380_v50 = vpop.f32.mrf.mxu1 }
 0xa40   : > { %v1681_v10 = vpop.f32.mrf.mxu1 }
 0xa42   : > { %v2403_v11 = vpop.f32.mrf.mxu1 }
 0xa44   : > { %v1684_v18 = vpop.f32.mrf.mxu1 }
 0xa46   : > { %v2404_v19 = vpop.f32.mrf.mxu1 }
 0xae3   : > { %v1460_v52 = vpop.f32.mrf.mxu0 }
 0xae4   : > { %v3026_v53 = vadd.f32 %v1460_v52, %v1082_v51 }
 0xae5   : > { %v2367_v54 = vpop.f32.mrf.mxu0 }
 0xae7   : > { %v1463_v55 = vpop.f32.mrf.mxu0 }
 0xae9   : > { %v2368_v56 = vpop.f32.mrf.mxu0 }
 0xaf3   : > { %v1607_v57 = vpop.f32.mrf.mxu0 }
 0xaf5   : > { %v2391_v58 = vpop.f32.mrf.mxu0 }
 0xaf7   : > { %v1610_v59 = vpop.f32.mrf.mxu0 }
 0xaf8   : > { %v1689_v60 = vpack.c.bf16 %v1610_v59, %v1607_v57 }
 0xaf9   : > { %v2392_v62 = vpop.f32.mrf.mxu0 }
 0xafa   : > { %v1694_v63 = vsel %vm552_vm2, %v1689_v60, 0 }
 0xafb   : > { %2406 = vmatpush3.bf16.xpose.msra.mxu0 %v1694_v63 }
 0xafc   : > { %2411 = vmatprep.subr.bf16.mxu0 %v2626_v1 }
 0xb02   : > { %2408 = vmatmul.mubr.msk.bf16.vlgmr.msra.gmra.mxu0 %vm552_vm2, %v1688_v0 }
 0xb03   : > { %2413 = vmatprep.mubr.msk.bf16.mxu0 %vm2627_vm0, %v2626_v1  ;;  %v1749_v1 = vpack.c.bf16 %v1684_v18, %v1681_v10 }
 0xb05   : > { %2412 = vmatpush3.bf16.msra.mxu0 %v1749_v1 }
 0xbc2   : > { %v1730_v4 = vpop.f32.mrf.mxu0 }
 0xbc3   : > { %v1736_v5 = vmul.f32 0.25, %v1730_v4 }
 0xbc4   : > { %v2409_v6 = vpop.f32.mrf.mxu0 }
 0xbc5   : > { %v1737_v7 = vsel %vm552_vm2, %v1736_v5, -inf }
 0xbc6   : > { %1738 = vmax.xlane.f32.xlu0 %v1737_v7  ;;  %v1733_v8 = vpop.f32.mrf.mxu0 }
 0xbc8   : > { %v2410_v9 = vpop.f32.mrf.mxu0 }
 0xc4f   : > { %v1739_v14 = vpop.xlane.xlu0 %1738 }
 0xc50   : > { %v1740_v15 = vsub.f32 %v1736_v5, %v1739_v14 }
 0xc52   : > { %v1741_v16 = vmul.f32 1.442695, %v1740_v15 }
 0xc54   : > { %2544 = vpow2.f32 %v1741_v16 }
 0xc61   : > { %v2545_v17 = vpop.eup %2544 }
 0xc62   : > { %v1743_v12 = vsel %vm552_vm2, %v2545_v17, 0.0 }
 0xc63   : > { %1744 = vadd.xlane.f32.xlu1 %v1743_v12 }
 0xcec   : > { %v1745_v21 = vpop.xlane.xlu1 %1744 }
 0xced   : > { %2546 = vrcp.f32 %v1745_v21 }
 0xcfa   : > { %v2547_v22 = vpop.eup %2546 }
 0xcfb   : > { %v1747_v23 = vmul.f32 %v2547_v22, %v2545_v17 }
 0xcfd   : > { %v1748_v24 = vpack.c.bf16 %v1747_v23, %v1747_v23 }
 0xcff   : > { %2414 = vmatmul.mubr.msk.bf16.vlgmr.msra.gmra.mxu0 %vm552_vm2, %v1748_v24 }
 0xdbf   : > { %v1787_v25 = vpop.f32.mrf.mxu0 }
 0xdc0   : > { %v1793_v26 = vpack.c.bf16 %v1787_v25, %v1787_v25 }
 0xdc1   : > { %v2415_v27 = vpop.f32.mrf.mxu0 }
 0xdc2   : > { %2420 = vmatmul.mubr.msk.bf16.vlgmr.msra.gmra.mxu1 %vm552_vm2, %v1793_v26 }
 0xdc3   : > { %v1790_v28 = vpop.f32.mrf.mxu0 }
 0xdc5   : > { %v2416_v29 = vpop.f32.mrf.mxu0 }
 0xe82   : > { %v1840_v30 = vpop.f32.mrf.mxu1 }
 0xe83   : > { %v1846_v32 = vadd.f32 %v1840_v30, %v3026_v53 }
 0xe84   : > { %v2421_v33 = vpop.f32.mrf.mxu1 }
 0xe85   : > { %v1854_v34 = vadd.f32 %v2117_v31, %v1846_v32 }
 0xe86   : > { %v1843_v35 = vpop.f32.mrf.mxu1 }
 0xe87   : > { %1855 = vst.msk [vmem:[%s306_s16] sm:$0xff] %vm357_vm1, %v1854_v34 }
 0xe88   : > { %v2422_v36 = vpop.f32.mrf.mxu1 }
 0xe89   : > { %2561 = shalt.err (!%p2558_p5)
}
 0xe8a   : > { %s2562_s10 = scalar_lea.hbm %s3069_s20, 128  ;;  %s2566_s15 = scalar_lea.hbm %s3123_s7, 256 }
 0xe8b   : > { %p2563_p6 = scmp.ne.s32.totalorder %s3069_s20, %s2562_s10  ;;  %p2567_p10 = scmp.lt.s32.totalorder %s3069_s20, %s3123_s7 }
 0xe8c   : > { %p2568_p11 = scmp.lt.s32.totalorder %s2566_s15, %s2562_s10 }
 0xe8d   : > { %p2564_p7 = pnand %p2563_p6, %p2709_p4 }
 0xe8e   : > { %p2569_p12 = por %p2568_p11, %p2567_p10 }
 0xe8f   : > { %p2565_p9 = pneg %p2564_p7 }
 0xe91   : > { %p2570_p13 = pnand %p2569_p12, %p2565_p9 }
 0xe93   : > { %2573 = shalt.err (!%p2570_p13)
}
 0xe94   : > { %2423 = dma.vmem_to_hbm [thread:$0]  (%p2709_p4), %s3071_s17, 128, %s3069_s20, %s1857_s27  }
 0xe95 PF: > { %p2429_p0 = scmp.ge.s32.totalorder %s2624_s29, 2  ;;  %s1883_s19 = sand.u32 1, %s2604_s24  }
 0xe96   : > { %s1884_s21 = scalar_lea.sflag [#allocation3], %s1883_s19 }
 0xe97   : > { %p2426_p1 = pnand %p2429_p0, %p2716_p8 }
 0xe99   : > { %p2427_p2 = pneg %p2426_p1 }
 0xe9b   : > { %2599 = dma.done.wait (%p2427_p2), %s1884_s21, 128  }
 0xe9c   : > { %2601 = vsyncadd (%p2427_p2), %s1884_s21, 4294967168  ;;  %s20_s29 = sadd.s32 1, %s2624_s29   ;;  %s3126_s24 = smov %s2608_s25 }
 0xe9d   : > { %p17_p3 = scmp.ge.s32.totalorder %s20_s29, 4   ;;  %s3127_s25 = smov %s2612_s26 }
 0xe9e   : > { %s3128_s26 = smov %s2722_s14  ;;  %s3129_s27 = smov %s2620_s28 }
 0xe9f   : > { %s3130_s28 = smov %s3132_s9  ;;  %19 = sbr.rel (!%p17_p3) target bundleno = 4 (0x4), region = 98 }
 0xea4   :  { %1889 = vsyncpa [#allocation3], 1 }
 0xea5   :  { %1891 = vsyncpa [#allocation3 + $0x1], 1 }

</bundles_post_ra>
